<compile_context>
chip_gen: v7x
topology: tpu7x:2x2x1
jax: 0.10.0
libtpu: 0.0.40
codegen_flags: <defaults>
</compile_context>

<pallas_src>
import functools

import jax
import jax.numpy as jnp
from jax.experimental import pallas as pl
from jax.experimental.pallas import tpu as pltpu


def _round_up(x: int, m: int) -> int:
    return ((x + m - 1) // m) * m


def _inverse_model_kernel(x_ref, w1_ref, w2_ref, o_ref):
    # fc1 (+ folded b1) on the MXU, f32 accumulation, ReLU on the VPU.
    h = jnp.dot(x_ref[...], w1_ref[...], preferred_element_type=jnp.float32)
    h = jnp.maximum(h, 0.0)                                   # (TB, H_pad) f32
    # fc2 (+ folded b2): N=1, so skip the MXU — VPU multiply + XLU lane reduce.
    y = jnp.sum(h * w2_ref[...], axis=-1, keepdims=True)      # (TB, 1)
    o_ref[...] = jnp.maximum(y, 0.0).astype(o_ref.dtype)      # output ReLU


def inverse_model_forward(encoded_now, encoded_next, all_actions, moa_lstm_h,
                          w1, b1, w2, b2):
    """Forward pass of InverseModel.

    w1: (input_dim, fc_hidden), b1: (1, fc_hidden) or (fc_hidden,),
    w2: (fc_hidden, 1),         b2: (1, 1) or scalar.
    """
    x = jnp.concatenate(
        [encoded_now, encoded_next, all_actions, moa_lstm_h], axis=-1
    ).astype(jnp.float32)
    batch, input_dim = x.shape
    fc_hidden = w1.shape[1]

    # Lane-aligned padded dims (+1 for the bias passthrough lanes).
    k_pad = _round_up(input_dim + 1, 128)
    h_pad = _round_up(fc_hidden + 1, 128)

    # Augmented first-layer weight:
    #   rows 0..input_dim-1, cols 0..fc_hidden-1 : w1
    #   row  input_dim,      cols 0..fc_hidden-1 : b1          (ones column of x)
    #   row  input_dim,      col  fc_hidden      : 1.0         (bias passthrough:
    #                                                          h[:, fc_hidden] == 1)
    w1_aug = jnp.zeros((k_pad, h_pad), jnp.float32)
    w1_aug = w1_aug.at[:input_dim, :fc_hidden].set(w1.astype(jnp.float32))
    w1_aug = w1_aug.at[input_dim, :fc_hidden].set(
        jnp.asarray(b1, jnp.float32).reshape(-1))
    w1_aug = w1_aug.at[input_dim, fc_hidden].set(1.0)

    # Second-layer weights as a lane row; b2 rides on the passthrough lane.
    w2_row = jnp.zeros((1, h_pad), jnp.float32)
    w2_row = w2_row.at[0, :fc_hidden].set(jnp.asarray(w2, jnp.float32).reshape(-1))
    w2_row = w2_row.at[0, fc_hidden].set(jnp.asarray(b2, jnp.float32).reshape(()))

    # Batch tiling: sublane-aligned single block for small batches, 256-row
    # tiles sharded across TensorCores for large batches.
    tb = 256 if batch >= 256 else _round_up(batch, 8)
    b_pad = _round_up(batch, tb)

    x_aug = jnp.zeros((b_pad, k_pad), jnp.float32)
    x_aug = x_aug.at[:batch, :input_dim].set(x)
    x_aug = x_aug.at[:batch, input_dim].set(1.0)   # ones column (carries b1)

    # MXU operands in bf16 (halves the w1 DMA, native MXU dtype); epilogue
    # math and w2/b2 stay in f32.
    x_bf16 = x_aug.astype(jnp.bfloat16)
    w1_bf16 = w1_aug.astype(jnp.bfloat16)

    out = pl.pallas_call(
        _inverse_model_kernel,
        out_shape=jax.ShapeDtypeStruct((b_pad, 1), jnp.float32),
        grid=(b_pad // tb,),
        in_specs=[
            pl.BlockSpec((tb, k_pad), lambda i: (i, 0)),
            pl.BlockSpec((k_pad, h_pad), lambda i: (0, 0)),
            pl.BlockSpec((1, h_pad), lambda i: (0, 0)),
        ],
        # TODO(synk): output last dim is 1 (masked store); if a downstream
        # consumer ever accepts a lane-dense layout, emit (tb, 128) and slice.
        out_specs=pl.BlockSpec((tb, 1), lambda i: (i, 0)),
        compiler_params=pltpu.CompilerParams(
            dimension_semantics=("parallel",)),
    )(x_bf16, w1_bf16, w2_row)
    return out[:batch]


def _reference(x, w1, b1, w2, b2):
    h = jnp.maximum(x @ w1 + jnp.asarray(b1).reshape(1, -1), 0.0)
    return jnp.maximum(h @ w2 + jnp.asarray(b2).reshape(1, 1), 0.0)


if __name__ == "__main__":
    # Small shapes consistent with the module's forward.
    batch = 2
    encoded_state_dim = 16
    all_actions_dim = 8
    lstm_hidden_dim = 32
    fc_hidden_dim = 32
    input_dim = encoded_state_dim * 2 + all_actions_dim + lstm_hidden_dim  # 72

    key = jax.random.PRNGKey(0)
    keys = jax.random.split(key, 8)
    encoded_now = jax.random.normal(keys[0], (batch, encoded_state_dim), jnp.float32)
    encoded_next = jax.random.normal(keys[1], (batch, encoded_state_dim), jnp.float32)
    all_actions = jax.random.normal(keys[2], (batch, all_actions_dim), jnp.float32)
    moa_lstm_h = jax.random.normal(keys[3], (batch, lstm_hidden_dim), jnp.float32)

    # Deterministic parameter init (same shapes as the nn.Linear layers,
    # stored as (in, out) — transpose of torch's (out, in)).
    w1 = jax.random.normal(keys[4], (input_dim, fc_hidden_dim), jnp.float32) * 0.1
    b1 = jax.random.normal(keys[5], (1, fc_hidden_dim), jnp.float32) * 0.1
    w2 = jax.random.normal(keys[6], (fc_hidden_dim, 1), jnp.float32) * 0.1
    b2 = jax.random.normal(keys[7], (1, 1), jnp.float32) * 0.1

    fwd = jax.jit(inverse_model_forward)
    out = fwd(encoded_now, encoded_next, all_actions, moa_lstm_h, w1, b1, w2, b2)
    out = jax.block_until_ready(out)
    assert out.shape == (batch, 1)

    x_full = jnp.concatenate(
        [encoded_now, encoded_next, all_actions, moa_lstm_h], axis=-1)

    # Tight check against a bf16-quantized reference (kernel feeds the MXU bf16
    # operands but accumulates in f32 — matches this to rounding noise).
    xq = x_full.astype(jnp.bfloat16).astype(jnp.float32)
    w1q = w1.astype(jnp.bfloat16).astype(jnp.float32)
    b1q = b1.astype(jnp.bfloat16).astype(jnp.float32)
    ref_q = _reference(xq, w1q, b1q, w2, b2)
    assert jnp.allclose(out, ref_q, atol=1e-4, rtol=1e-4), \
        "mismatch vs bf16-quantized reference"

    # Loose check against the full-f32 reference (bounds bf16 quantization error).
    ref_f32 = _reference(x_full, w1, b1, w2, b2)
    assert jnp.allclose(out, ref_f32, atol=5e-2, rtol=5e-2), \
        "mismatch vs f32 reference beyond bf16 tolerance"

    print("KERNEL_OK")
</pallas_src>

<mosaic_0001>
module attributes {stable_mosaic.version = 11 : i64} {
  func.func @_inverse_model_kernel(%arg0: i32, %arg1: memref<8x128xbf16, #tpu.memory_space<vmem>>, %arg2: memref<128x128xbf16, #tpu.memory_space<vmem>>, %arg3: memref<1x128xf32, #tpu.memory_space<vmem>>, %arg4: memref<8x1xf32, #tpu.memory_space<vmem>>) attributes {dimension_semantics = [#tpu.dimension_semantics<parallel>], iteration_bounds = array<i64: 1>, scalar_prefetch = 0 : i64, scratch_operands = 0 : i64, tpu.core_type = #tpu.core_type<tc>, window_params = [{transform_indices = @transform_0, window_bounds = array<i64: 8, 128>}, {pipeline_mode = #tpu.pipeline_mode<synchronous>, transform_indices = @transform_1, window_bounds = array<i64: 128, 128>}, {pipeline_mode = #tpu.pipeline_mode<synchronous>, transform_indices = @transform_2, window_bounds = array<i64: 1, 128>}, {transform_indices = @transform_3, window_bounds = array<i64: 8, 1>}]} {
    %c0 = arith.constant 0 : index
    %c0_0 = arith.constant 0 : index
    %0 = vector.load %arg1[%c0, %c0_0] : memref<8x128xbf16, #tpu.memory_space<vmem>>, vector<8x128xbf16>
    %c0_1 = arith.constant 0 : index
    %c0_2 = arith.constant 0 : index
    %1 = vector.load %arg2[%c0_1, %c0_2] : memref<128x128xbf16, #tpu.memory_space<vmem>>, vector<128x128xbf16>
    %cst = arith.constant dense<0.000000e+00> : vector<8x128xf32>
    %2 = tpu.matmul %0, %1, %cst {dimension_numbers = #tpu.dot_dimension_numbers<[1], [0], [0], [1], [0, 0, 1, 1], [], []>} : vector<8x128xbf16>, vector<128x128xbf16>, vector<8x128xf32> -> vector<8x128xf32>
    %cst_3 = arith.constant 0.000000e+00 : f32
    %3 = vector.broadcast %cst_3 : f32 to vector<8x128xf32>
    %4 = arith.maximumf %2, %3 : vector<8x128xf32>
    %c0_4 = arith.constant 0 : index
    %c0_5 = arith.constant 0 : index
    %5 = vector.load %arg3[%c0_4, %c0_5] : memref<1x128xf32, #tpu.memory_space<vmem>>, vector<1x128xf32>
    %6 = vector.broadcast %5 : vector<1x128xf32> to vector<8x128xf32>
    %7 = arith.mulf %4, %6 : vector<8x128xf32>
    %cst_6 = arith.constant dense<0.000000e+00> : vector<8xf32>
    %8 = vector.multi_reduction <add>, %7, %cst_6 [1] : vector<8x128xf32> to vector<8xf32>
    %9 = vector.shape_cast %8 : vector<8xf32> to vector<8x1xf32>
    %cst_7 = arith.constant 0.000000e+00 : f32
    %10 = vector.broadcast %cst_7 : f32 to vector<8x1xf32>
    %11 = arith.maximumf %9, %10 : vector<8x1xf32>
    %c0_8 = arith.constant 0 : index
    %c0_9 = arith.constant 0 : index
    %12 = vector.load %arg4[%c0_8, %c0_9] : memref<8x1xf32, #tpu.memory_space<vmem>>, vector<8x1xf32>
    tpu.vector_store %arg4[%c0_8, %c0_9], %11 {strides = array<i32>} : memref<8x1xf32, #tpu.memory_space<vmem>>, vector<8x1xf32>,
    return
  }
  func.func @transform_0(%arg0: i32) -> (i32, i32) {
    %c0_i32 = arith.constant 0 : i32
    %c0_i32_0 = arith.constant 0 : i32
    return %arg0, %c0_i32 : i32, i32
  }
  func.func @transform_1(%arg0: i32) -> (i32, i32) {
    %c0_i32 = arith.constant 0 : i32
    %c0_i32_0 = arith.constant 0 : i32
    %c0_i32_1 = arith.constant 0 : i32
    return %c0_i32, %c0_i32_0 : i32, i32
  }
  func.func @transform_2(%arg0: i32) -> (i32, i32) {
    %c0_i32 = arith.constant 0 : i32
    %c0_i32_0 = arith.constant 0 : i32
    %c0_i32_1 = arith.constant 0 : i32
    return %c0_i32, %c0_i32_0 : i32, i32
  }
  func.func @transform_3(%arg0: i32) -> (i32, i32) {
    %c0_i32 = arith.constant 0 : i32
    %c0_i32_0 = arith.constant 0 : i32
    return %arg0, %c0_i32 : i32, i32
  }
}

</mosaic_0001>

<bundles_post_ra>
// kernel: inverse_model_forward.1
= control target key start
LH: loop header
LB: loop body
LE: loop exit
PB: predicated region body
PF: predicated region fallthrough
CT: control target
= control target key end

     0   :  { %v186_v0 = vmov 0.0   ;;  %vm187_vm0 = vmmov 0   ;;  %vm132_vm1 = vcmask 7168   ;;  %s241_s1 = inlined_call_operand.vmem [shape: bf16[128,128], index: 1, kind: input, shape index: {}]   ;;  %s242_s0 = inlined_call_operand.vmem [shape: bf16[8,128], index: 0, kind: input, shape index: {}]   ;;  %s243_s2 = inlined_call_operand.vmem [shape: f32[1,128], index: 2, kind: input, shape index: {}]   ;;  %s244_s3 = inlined_call_operand.vmem [shape: f32[8,1], index: 3, kind: output, shape index: {}]  }
   0x1   :  { %156 = vmatprep.subr.bf16.mxu0 %v186_v0  ;;  %v178_v1 = vld [vmem:[%s241_s1] sm:$0xff]   ;;  %172 = vmatprep.mubr.msk.bf16.mxu0 %vm187_vm0, %v186_v0  ;;  %v179_v2 = vld [vmem:[%s241_s1 + $0x8] sm:$0xff]   ;;  %v180_v3 = vld [vmem:[%s241_s1 + $0x10] sm:$0xff]  }
   0x2   :  { %157 = vmatpush3.bf16.msra.mxu0 %v178_v1  ;;  %v181_v4 = vld [vmem:[%s241_s1 + $0x18] sm:$0xff]   ;;  %v182_v5 = vld [vmem:[%s241_s1 + $0x20] sm:$0xff]   ;;  %v183_v6 = vld [vmem:[%s241_s1 + $0x28] sm:$0xff]  }
   0x3   :  { %158 = vmatprep.subr.bf16.mxu0 %v186_v0  ;;  %v184_v7 = vld [vmem:[%s241_s1 + $0x30] sm:$0xff]   ;;  %v185_v8 = vld [vmem:[%s241_s1 + $0x38] sm:$0xff]   ;;  %v15_v9 = vld [vmem:[%s242_s0] sm:$0xf] }
   0x4   :  { %v146_v11 = vld [vmem:[%s243_s2] ss:$0 sm:$0xff] }
   0x6   :  { %159 = vmatpush3.bf16.msra.mxu0 %v179_v2 }
   0x7   :  { %160 = vmatprep.subr.bf16.mxu0 %v186_v0 }
   0xa   :  { %161 = vmatpush3.bf16.msra.mxu0 %v180_v3 }
   0xb   :  { %162 = vmatprep.subr.bf16.mxu0 %v186_v0 }
   0xe   :  { %163 = vmatpush3.bf16.msra.mxu0 %v181_v4 }
   0xf   :  { %164 = vmatprep.subr.bf16.mxu0 %v186_v0 }
  0x12   :  { %165 = vmatpush3.bf16.msra.mxu0 %v182_v5 }
  0x13   :  { %166 = vmatprep.subr.bf16.mxu0 %v186_v0 }
  0x16   :  { %167 = vmatpush3.bf16.msra.mxu0 %v183_v6 }
  0x17   :  { %168 = vmatprep.subr.bf16.mxu0 %v186_v0 }
  0x1a   :  { %169 = vmatpush3.bf16.msra.mxu0 %v184_v7 }
  0x1b   :  { %170 = vmatprep.subr.bf16.mxu0 %v186_v0 }
  0x1e   :  { %171 = vmatpush3.bf16.msra.mxu0 %v185_v8 }
  0x21   :  { %173 = vmatmul.mubr.bf16.vlgmr.msra.gmra.mrb[0].mxu0 %v15_v9 }
  0xf4   :  { %v114_v10 = vpop.f32.mrb[0].mxu0 }
  0xf5   :  { %v120_v12 = vmax.f32 %v114_v10, 0.0  ;;  %v174_v13 = vpop.f32.mrb[1].mxu0 }
  0xf6   :  { %v117_v14 = vpop.f32.mrb[2].mxu0 }
  0xf7   :  { %v175_v15 = vpop.f32.mrb[3].mxu0  ;;  %v128_v16 = vmul.f32 %v146_v11, %v120_v12 }
  0xf9   :  { %129 = vadd.xlane.f32.xlu0 %v128_v16 }
 0x186   :  { %v130_v17 = vpop.xlane.xlu0 %129 }
 0x187   :  { %v131_v18 = vmax.f32 %v130_v17, 0.0 }
 0x189   :  { %133 = vst.msk [vmem:[%s244_s3] sm:$0xff] %vm132_vm1, %v131_v18 }

</bundles_post_ra>
